<compile_context>
chip_gen: v5e
topology: v5e:2x2
jax: 0.10.0
libtpu: 0.0.40
codegen_flags: <defaults>
</compile_context>

<pallas_src>
import functools

import jax
import jax.numpy as jnp
from jax.experimental import pallas as pl
from jax.experimental.pallas import tpu as pltpu

LANE = 128     # TPU lane width: hidden/output feature dims are padded to this
SUBLANE = 8    # f32 sublane width: batch tiles should be a multiple of this


def _round_up(n, m):
    return ((n + m - 1) // m) * m


def mlp_kernel(x_ref,
               w1_ref, b1_ref,
               w2_ref, b2_ref,
               w3_ref, b3_ref,
               w4_ref, b4_ref,
               out_ref):
    """Fused MLP: 3x(Linear+ReLU) + Linear. Weights pre-transposed/padded to
    [in_pad, out_pad], fully VMEM-resident; x/out batch-tiled; f32 accumulation."""
    h = x_ref[...]
    h = jnp.maximum(
        jnp.dot(h, w1_ref[...], preferred_element_type=jnp.float32) + b1_ref[...], 0.0)
    h = jnp.maximum(
        jnp.dot(h, w2_ref[...], preferred_element_type=jnp.float32) + b2_ref[...], 0.0)
    h = jnp.maximum(
        jnp.dot(h, w3_ref[...], preferred_element_type=jnp.float32) + b3_ref[...], 0.0)
    # TODO(synk): dropout (use_dropout) and BatchNorm1d (use_bn) branches are
    # disabled by default in the PyTorch module and are not implemented here.
    out = jnp.dot(h, w4_ref[...], preferred_element_type=jnp.float32) + b4_ref[...]
    out_ref[...] = out.astype(out_ref.dtype)


def prepare_params(params):
    """One-time conversion from PyTorch layout (W:[out,in], b:[out]) to kernel
    layout: weights transposed to [in,out] and zero-padded so every hidden /
    output feature dim is a 128-lane multiple. Call once, NOT per forward.
    Zero padding is numerically exact (padded lanes stay 0 through ReLU and
    contribute nothing to later dots)."""
    w1, b1 = params["hidden1"]
    w2, b2 = params["hidden2"]
    w3, b3 = params["hidden3"]
    w4, b4 = params["classification_layer"]

    num_classes = w4.shape[0]
    hidden = w1.shape[0]
    feat = w1.shape[1]
    hid_pad = _round_up(hidden, LANE)
    out_pad = _round_up(num_classes, LANE)
    f32 = jnp.float32

    def pad_wt(w, rows, cols):
        wt = jnp.asarray(w, f32).T                      # [in, out]
        return jnp.zeros((rows, cols), f32).at[:wt.shape[0], :wt.shape[1]].set(wt)

    def pad_b(b, cols):
        b = jnp.asarray(b, f32)
        return jnp.zeros((1, cols), f32).at[0, :b.shape[0]].set(b)

    kernel_args = (
        pad_wt(w1, feat, hid_pad),    pad_b(b1, hid_pad),
        pad_wt(w2, hid_pad, hid_pad), pad_b(b2, hid_pad),
        pad_wt(w3, hid_pad, hid_pad), pad_b(b3, hid_pad),
        pad_wt(w4, hid_pad, out_pad), pad_b(b4, out_pad),
    )
    return kernel_args, num_classes


@functools.partial(jax.jit, static_argnames=("num_classes", "tile_b"))
def feed_forward_nn(x, kernel_args, *, num_classes, tile_b=512):
    """x: [B, C, H, W] float32; kernel_args from prepare_params()."""
    B = x.shape[0]
    x_flat = x.reshape(B, -1).astype(jnp.float32)       # x.view(x.size(0), -1)
    feat = x_flat.shape[1]
    out_pad = kernel_args[-1].shape[1]                   # padded class dim (static)

    # Batch tile: sublane-aligned, no wrapper-side padding of x (Pallas masks the
    # partial last block: OOB reads padded, OOB writes dropped; rows independent).
    if B <= SUBLANE:
        tb = B                                           # block == full dim (allowed)
    else:
        tb = min(tile_b, _round_up(B, SUBLANE))
        # v7x: ensure >= 2 grid steps so the "parallel" axis shards across both
        # TensorCores; no-op cost on single-TC v5e/v6e.
        if B >= 2 * SUBLANE and pl.cdiv(B, tb) < 2:
            tb = _round_up(pl.cdiv(B, 2), SUBLANE)

    grid = (pl.cdiv(B, tb),)
    vmem_full = pl.BlockSpec(memory_space=pltpu.MemorySpace.VMEM)  # full-array resident

    out_padded = pl.pallas_call(
        mlp_kernel,
        out_shape=jax.ShapeDtypeStruct((B, out_pad), jnp.float32),
        grid=grid,
        in_specs=[pl.BlockSpec((tb, feat), lambda i: (i, 0))] + [vmem_full] * 8,
        out_specs=pl.BlockSpec((tb, out_pad), lambda i: (i, 0)),
        compiler_params=pltpu.CompilerParams(dimension_semantics=("parallel",)),
    )(x_flat, *kernel_args)

    return out_padded[:, :num_classes]


def init_params(key, input_size, hidden_size, output_size):
    """Deterministic init mimicking nn.Linear default (uniform ±1/sqrt(fan_in)),
    stored in PyTorch convention W:[out_features, in_features]."""
    def linear(k, fan_in, fan_out):
        kw, kb = jax.random.split(k)
        bound = 1.0 / jnp.sqrt(fan_in)
        w = jax.random.uniform(kw, (fan_out, fan_in), jnp.float32, -bound, bound)
        b = jax.random.uniform(kb, (fan_out,), jnp.float32, -bound, bound)
        return w, b

    k1, k2, k3, k4 = jax.random.split(key, 4)
    return {
        "hidden1": linear(k1, input_size, hidden_size),
        "hidden2": linear(k2, hidden_size, hidden_size),
        "hidden3": linear(k3, hidden_size, hidden_size),
        "classification_layer": linear(k4, hidden_size, output_size),
    }


def ref_forward(x, params):
    """Plain-JAX reference matching the PyTorch forward (defaults: no BN/dropout)."""
    h = x.reshape(x.shape[0], -1)
    w1, b1 = params["hidden1"]
    w2, b2 = params["hidden2"]
    w3, b3 = params["hidden3"]
    w4, b4 = params["classification_layer"]
    h = jnp.maximum(h @ w1.T + b1, 0.0)
    h = jnp.maximum(h @ w2.T + b2, 0.0)
    h = jnp.maximum(h @ w3.T + b3, 0.0)
    return h @ w4.T + b4


if __name__ == "__main__":
    key = jax.random.PRNGKey(0)
    kx, kp = jax.random.split(key)

    B, C, H, W = 2, 4, 16, 16
    input_size = C * H * W      # 1024
    hidden_size = 32
    output_size = 10

    x = jax.random.normal(kx, (B, C, H, W), jnp.float32)
    params = init_params(kp, input_size, hidden_size, output_size)

    # One-time parameter prep (transpose + lane padding) — outside the hot path.
    kernel_args, num_classes = prepare_params(params)
    kernel_args = jax.block_until_ready(kernel_args)

    out = feed_forward_nn(x, kernel_args, num_classes=num_classes)
    out = jax.block_until_ready(out)

    expected = ref_forward(x, params)
    assert out.shape == (B, output_size)
    assert jnp.allclose(out, expected, atol=1e-4, rtol=1e-4)

    print("KERNEL_OK")
</pallas_src>

<mosaic_0001>
module attributes {stable_mosaic.version = 11 : i64} {
  func.func @mlp_kernel(%arg0: i32, %arg1: memref<2x1024xf32, #tpu.memory_space<vmem>>, %arg2: memref<1024x128xf32, #tpu.memory_space<vmem>>, %arg3: memref<1x128xf32, #tpu.memory_space<vmem>>, %arg4: memref<128x128xf32, #tpu.memory_space<vmem>>, %arg5: memref<1x128xf32, #tpu.memory_space<vmem>>, %arg6: memref<128x128xf32, #tpu.memory_space<vmem>>, %arg7: memref<1x128xf32, #tpu.memory_space<vmem>>, %arg8: memref<128x128xf32, #tpu.memory_space<vmem>>, %arg9: memref<1x128xf32, #tpu.memory_space<vmem>>, %arg10: memref<2x128xf32, #tpu.memory_space<vmem>>) attributes {dimension_semantics = [#tpu.dimension_semantics<parallel>], iteration_bounds = array<i64: 1>, scalar_prefetch = 0 : i64, scratch_operands = 0 : i64, tpu.core_type = #tpu.core_type<tc>, window_params = [{transform_indices = @transform_0, window_bounds = array<i64: 2, 1024>}, {pipeline_mode = #tpu.pipeline_mode<synchronous>, transform_indices = @transform_1, window_bounds = array<i64: 1024, 128>}, {pipeline_mode = #tpu.pipeline_mode<synchronous>, transform_indices = @transform_2, window_bounds = array<i64: 1, 128>}, {pipeline_mode = #tpu.pipeline_mode<synchronous>, transform_indices = @transform_3, window_bounds = array<i64: 128, 128>}, {pipeline_mode = #tpu.pipeline_mode<synchronous>, transform_indices = @transform_4, window_bounds = array<i64: 1, 128>}, {pipeline_mode = #tpu.pipeline_mode<synchronous>, transform_indices = @transform_5, window_bounds = array<i64: 128, 128>}, {pipeline_mode = #tpu.pipeline_mode<synchronous>, transform_indices = @transform_6, window_bounds = array<i64: 1, 128>}, {pipeline_mode = #tpu.pipeline_mode<synchronous>, transform_indices = @transform_7, window_bounds = array<i64: 128, 128>}, {pipeline_mode = #tpu.pipeline_mode<synchronous>, transform_indices = @transform_8, window_bounds = array<i64: 1, 128>}, {transform_indices = @transform_9, window_bounds = array<i64: 2, 128>}]} {
    %c0 = arith.constant 0 : index
    %c0_0 = arith.constant 0 : index
    %0 = vector.load %arg1[%c0, %c0_0] : memref<2x1024xf32, #tpu.memory_space<vmem>>, vector<2x1024xf32>
    %c0_1 = arith.constant 0 : index
    %c0_2 = arith.constant 0 : index
    %1 = vector.load %arg2[%c0_1, %c0_2] : memref<1024x128xf32, #tpu.memory_space<vmem>>, vector<1024x128xf32>
    %cst = arith.constant dense<0.000000e+00> : vector<2x128xf32>
    %2 = tpu.matmul %0, %1, %cst {dimension_numbers = #tpu.dot_dimension_numbers<[1], [0], [0], [1], [0, 0, 1, 1], [], []>} : vector<2x1024xf32>, vector<1024x128xf32>, vector<2x128xf32> -> vector<2x128xf32>
    %c0_3 = arith.constant 0 : index
    %c0_4 = arith.constant 0 : index
    %3 = vector.load %arg3[%c0_3, %c0_4] : memref<1x128xf32, #tpu.memory_space<vmem>>, vector<1x128xf32>
    %4 = vector.broadcast %3 : vector<1x128xf32> to vector<2x128xf32>
    %5 = arith.addf %2, %4 : vector<2x128xf32>
    %cst_5 = arith.constant 0.000000e+00 : f32
    %6 = vector.broadcast %cst_5 : f32 to vector<2x128xf32>
    %7 = arith.maximumf %5, %6 : vector<2x128xf32>
    %c0_6 = arith.constant 0 : index
    %c0_7 = arith.constant 0 : index
    %8 = vector.load %arg4[%c0_6, %c0_7] : memref<128x128xf32, #tpu.memory_space<vmem>>, vector<128x128xf32>
    %cst_8 = arith.constant dense<0.000000e+00> : vector<2x128xf32>
    %9 = tpu.matmul %7, %8, %cst_8 {dimension_numbers = #tpu.dot_dimension_numbers<[1], [0], [0], [1], [0, 0, 1, 1], [], []>} : vector<2x128xf32>, vector<128x128xf32>, vector<2x128xf32> -> vector<2x128xf32>
    %c0_9 = arith.constant 0 : index
    %c0_10 = arith.constant 0 : index
    %10 = vector.load %arg5[%c0_9, %c0_10] : memref<1x128xf32, #tpu.memory_space<vmem>>, vector<1x128xf32>
    %11 = vector.broadcast %10 : vector<1x128xf32> to vector<2x128xf32>
    %12 = arith.addf %9, %11 : vector<2x128xf32>
    %cst_11 = arith.constant 0.000000e+00 : f32
    %13 = vector.broadcast %cst_11 : f32 to vector<2x128xf32>
    %14 = arith.maximumf %12, %13 : vector<2x128xf32>
    %c0_12 = arith.constant 0 : index
    %c0_13 = arith.constant 0 : index
    %15 = vector.load %arg6[%c0_12, %c0_13] : memref<128x128xf32, #tpu.memory_space<vmem>>, vector<128x128xf32>
    %cst_14 = arith.constant dense<0.000000e+00> : vector<2x128xf32>
    %16 = tpu.matmul %14, %15, %cst_14 {dimension_numbers = #tpu.dot_dimension_numbers<[1], [0], [0], [1], [0, 0, 1, 1], [], []>} : vector<2x128xf32>, vector<128x128xf32>, vector<2x128xf32> -> vector<2x128xf32>
    %c0_15 = arith.constant 0 : index
    %c0_16 = arith.constant 0 : index
    %17 = vector.load %arg7[%c0_15, %c0_16] : memref<1x128xf32, #tpu.memory_space<vmem>>, vector<1x128xf32>
    %18 = vector.broadcast %17 : vector<1x128xf32> to vector<2x128xf32>
    %19 = arith.addf %16, %18 : vector<2x128xf32>
    %cst_17 = arith.constant 0.000000e+00 : f32
    %20 = vector.broadcast %cst_17 : f32 to vector<2x128xf32>
    %21 = arith.maximumf %19, %20 : vector<2x128xf32>
    %c0_18 = arith.constant 0 : index
    %c0_19 = arith.constant 0 : index
    %22 = vector.load %arg8[%c0_18, %c0_19] : memref<128x128xf32, #tpu.memory_space<vmem>>, vector<128x128xf32>
    %cst_20 = arith.constant dense<0.000000e+00> : vector<2x128xf32>
    %23 = tpu.matmul %21, %22, %cst_20 {dimension_numbers = #tpu.dot_dimension_numbers<[1], [0], [0], [1], [0, 0, 1, 1], [], []>} : vector<2x128xf32>, vector<128x128xf32>, vector<2x128xf32> -> vector<2x128xf32>
    %c0_21 = arith.constant 0 : index
    %c0_22 = arith.constant 0 : index
    %24 = vector.load %arg9[%c0_21, %c0_22] : memref<1x128xf32, #tpu.memory_space<vmem>>, vector<1x128xf32>
    %25 = vector.broadcast %24 : vector<1x128xf32> to vector<2x128xf32>
    %26 = arith.addf %23, %25 : vector<2x128xf32>
    %c0_23 = arith.constant 0 : index
    %c0_24 = arith.constant 0 : index
    %27 = vector.load %arg10[%c0_23, %c0_24] : memref<2x128xf32, #tpu.memory_space<vmem>>, vector<2x128xf32>
    tpu.vector_store %arg10[%c0_23, %c0_24], %26 {strides = array<i32>} : memref<2x128xf32, #tpu.memory_space<vmem>>, vector<2x128xf32>,
    return
  }
  func.func @transform_0(%arg0: i32) -> (i32, i32) {
    %c0_i32 = arith.constant 0 : i32
    %c0_i32_0 = arith.constant 0 : i32
    return %arg0, %c0_i32 : i32, i32
  }
  func.func @transform_1(%arg0: i32) -> (i32, i32) {
    %c0_i32 = arith.constant 0 : i32
    %c0_i32_0 = arith.constant 0 : i32
    %c0_i32_1 = arith.constant 0 : i32
    return %c0_i32, %c0_i32_0 : i32, i32
  }
  func.func @transform_2(%arg0: i32) -> (i32, i32) {
    %c0_i32 = arith.constant 0 : i32
    %c0_i32_0 = arith.constant 0 : i32
    %c0_i32_1 = arith.constant 0 : i32
    return %c0_i32, %c0_i32_0 : i32, i32
  }
  func.func @transform_3(%arg0: i32) -> (i32, i32) {
    %c0_i32 = arith.constant 0 : i32
    %c0_i32_0 = arith.constant 0 : i32
    %c0_i32_1 = arith.constant 0 : i32
    return %c0_i32, %c0_i32_0 : i32, i32
  }
  func.func @transform_4(%arg0: i32) -> (i32, i32) {
    %c0_i32 = arith.constant 0 : i32
    %c0_i32_0 = arith.constant 0 : i32
    %c0_i32_1 = arith.constant 0 : i32
    return %c0_i32, %c0_i32_0 : i32, i32
  }
  func.func @transform_5(%arg0: i32) -> (i32, i32) {
    %c0_i32 = arith.constant 0 : i32
    %c0_i32_0 = arith.constant 0 : i32
    %c0_i32_1 = arith.constant 0 : i32
    return %c0_i32, %c0_i32_0 : i32, i32
  }
  func.func @transform_6(%arg0: i32) -> (i32, i32) {
    %c0_i32 = arith.constant 0 : i32
    %c0_i32_0 = arith.constant 0 : i32
    %c0_i32_1 = arith.constant 0 : i32
    return %c0_i32, %c0_i32_0 : i32, i32
  }
  func.func @transform_7(%arg0: i32) -> (i32, i32) {
    %c0_i32 = arith.constant 0 : i32
    %c0_i32_0 = arith.constant 0 : i32
    %c0_i32_1 = arith.constant 0 : i32
    return %c0_i32, %c0_i32_0 : i32, i32
  }
  func.func @transform_8(%arg0: i32) -> (i32, i32) {
    %c0_i32 = arith.constant 0 : i32
    %c0_i32_0 = arith.constant 0 : i32
    %c0_i32_1 = arith.constant 0 : i32
    return %c0_i32, %c0_i32_0 : i32, i32
  }
  func.func @transform_9(%arg0: i32) -> (i32, i32) {
    %c0_i32 = arith.constant 0 : i32
    %c0_i32_0 = arith.constant 0 : i32
    return %arg0, %c0_i32 : i32, i32
  }
}

</mosaic_0001>

<bundles_post_ra>
// kernel: feed_forward_nn.1
= control target key start
LH: loop header
LB: loop body
LE: loop exit
PB: predicated region body
PF: predicated region fallthrough
CT: control target
= control target key end

     0   :  { %14 = vsyncpa [#allocation3], 0  ;;  %s783_s0 = inlined_call_operand.vmem [shape: f32[2,1024], index: 0, kind: input, shape index: {}]   ;;  %s784_s1 = inlined_call_operand.hbm [shape: f32[1024,128], index: 1, kind: input, shape index: {}]   ;;  %s785_s2 = inlined_call_operand.vmem [shape: f32[1,128], index: 2, kind: input, shape index: {}]   ;;  %s786_s3 = inlined_call_operand.vmem [shape: f32[128,128], index: 3, kind: input, shape index: {}]   ;;  %s787_s4 = inlined_call_operand.vmem [shape: f32[1,128], index: 4, kind: input, shape index: {}]   ;;  %s788_s5 = inlined_call_operand.hbm [shape: f32[128,128], index: 5, kind: input, shape index: {}]   ;;  %s789_s6 = inlined_call_operand.vmem [shape: f32[1,128], index: 6, kind: input, shape index: {}]   ;;  %s790_s7 = inlined_call_operand.hbm [shape: f32[128,128], index: 7, kind: input, shape index: {}]   ;;  %s791_s8 = inlined_call_operand.vmem [shape: f32[1,128], index: 8, kind: input, shape index: {}]   ;;  %s792_s9 = inlined_call_operand.hbm [shape: f32[2,128], index: 9, kind: output, shape index: {}]  }
   0x1   :  { %15 = vsyncpa [#allocation6], 0 }
   0x2   :  { %16 = vsyncpa [#allocation4], 0  ;;  %s42_s11 = sshll.u32 %s788_s5, 4  ;;  %s649_s12 = smov [#allocation5]   ;;  %s43_s11 = int_to_ptr.hbm [resolvable:$true] %s42_s11 }
   0x3   :  { %s44_s13 = sshll.u32 %s649_s12, 4  ;;  %s23_s16 = sshll.u32 %s784_s1, 4  ;;  %s45_s13 = int_to_ptr.vmem [resolvable:$true] %s44_s13  ;;  %s24_s16 = int_to_ptr.hbm [resolvable:$true] %s23_s16 }
   0x4   :  { %s650_s17 = smov 128   ;;  %s651_s18 = smov 8  }
   0x5   :  { %50 = dma.hbm_to_vmem [thread:$0]  %s43_s11, 2048, %s45_s13, [#allocation6], %s650_s17, %s650_s17, %s651_s18  }
   0x6   :  { %s652_s19 = smov [#allocation2]   ;;  %s57_s23 = sshll.u32 %s790_s7, 4  ;;  %s58_s23 = int_to_ptr.hbm [resolvable:$true] %s57_s23 }
   0x7   :  { %s25_s20 = sshll.u32 %s652_s19, 4  ;;  %s653_s5 = smov [#allocation7]   ;;  %s26_s20 = int_to_ptr.vmem [resolvable:$true] %s25_s20 }
   0x8   :  { %31 = dma.hbm_to_vmem [thread:$0]  %s24_s16, 16384, %s26_s20, [#allocation3], %s650_s17, %s650_s17, %s651_s18  }
   0x9   :  { %s59_s24 = sshll.u32 %s653_s5, 4  ;;  %s60_s24 = int_to_ptr.vmem [resolvable:$true] %s59_s24 }
   0xa   :  { %65 = dma.hbm_to_vmem [thread:$0]  %s58_s23, 2048, %s60_s24, [#allocation6], %s650_s17, %s650_s17, %s651_s18  }
   0xb   :  { %643 = dma.done.wait [#allocation3], 16384  }
   0xc   :  { %644 = vsyncadd [#allocation3], 4294950912 }
   0xd   :  { %645 = dma.done.wait [#allocation6], 4096  }
   0xe   :  { %646 = vsyncadd [#allocation6], 4294963200  ;;  %v129_v0 = vld [vmem:[#allocation2 + $0x178] sm:$0xff]  ;;  %v128_v2 = vld [vmem:[#allocation2 + $0x170] sm:$0xff]  ;;  %s654_s17 = smov [#allocation8]   ;;  %s526_s21 = sshll.u32 %s792_s9, 4  ;;  %s527_s21 = int_to_ptr.hbm [resolvable:$true] %s526_s21 }
   0xf   :  { %v97_v1 = vld [vmem:[#allocation2 + $0x78] sm:$0xff]  ;;  %275 = vmatpush.msra.mxu2 %v129_v0  ;;  %v96_v4 = vld [vmem:[#allocation2 + $0x70] sm:$0xff]  ;;  %v127_v6 = vld [vmem:[#allocation2 + $0x168] sm:$0xff]  ;;  %s524_s18 = sshll.u32 %s654_s17, 4  ;;  %s525_s18 = int_to_ptr.vmem [resolvable:$true] %s524_s18 }
  0x10   :  { %235 = vmatpush.msra.mxu0 %v97_v1  ;;  %v145_v3 = vld [vmem:[#allocation2 + $0x1f8] sm:$0xff]  ;;  %v144_v7 = vld [vmem:[#allocation2 + $0x1f0] sm:$0xff]  ;;  %v95_v8 = vld [vmem:[#allocation2 + $0x68] sm:$0xff] }
  0x11   :  { %v113_v5 = vld [vmem:[#allocation2 + $0xf8] sm:$0xff]  ;;  %295 = vmatpush.msra.mxu3 %v145_v3  ;;  %276 = vmatpush.msra.mxu2 %v128_v2  ;;  %v112_v9 = vld [vmem:[#allocation2 + $0xf0] sm:$0xff]  ;;  %v143_v10 = vld [vmem:[#allocation2 + $0x1e8] sm:$0xff] }
  0x12   :  { %255 = vmatpush.msra.mxu1 %v113_v5  ;;  %236 = vmatpush.msra.mxu0 %v96_v4  ;;  %v126_v11 = vld [vmem:[#allocation2 + $0x160] sm:$0xff]  ;;  %v111_v13 = vld [vmem:[#allocation2 + $0xe8] sm:$0xff]  ;;  %v125_v16 = vld [vmem:[#allocation2 + $0x158] sm:$0xff] }
  0x13   :  { %296 = vmatpush.msra.mxu3 %v144_v7  ;;  %v94_v12 = vld [vmem:[#allocation2 + $0x60] sm:$0xff]  ;;  %277 = vmatpush.msra.mxu2 %v127_v6  ;;  %v93_v17 = vld [vmem:[#allocation2 + $0x58] sm:$0xff]  ;;  %v124_v20 = vld [vmem:[#allocation2 + $0x150] sm:$0xff] }
  0x14   :  { %256 = vmatpush.msra.mxu1 %v112_v9  ;;  %237 = vmatpush.msra.mxu0 %v95_v8  ;;  %v142_v14 = vld [vmem:[#allocation2 + $0x1e0] sm:$0xff]  ;;  %v141_v18 = vld [vmem:[#allocation2 + $0x1d8] sm:$0xff]  ;;  %v92_v21 = vld [vmem:[#allocation2 + $0x50] sm:$0xff] }
  0x15   :  { %v110_v15 = vld [vmem:[#allocation2 + $0xe0] sm:$0xff]  ;;  %297 = vmatpush.msra.mxu3 %v143_v10  ;;  %278 = vmatpush.msra.mxu2 %v126_v11  ;;  %v109_v19 = vld [vmem:[#allocation2 + $0xd8] sm:$0xff]  ;;  %v140_v22 = vld [vmem:[#allocation2 + $0x1d0] sm:$0xff] }
  0x16   :  { %257 = vmatpush.msra.mxu1 %v111_v13  ;;  %238 = vmatpush.msra.mxu0 %v94_v12  ;;  %v108_v23 = vld [vmem:[#allocation2 + $0xd0] sm:$0xff]  ;;  %v123_v24 = vld [vmem:[#allocation2 + $0x148] sm:$0xff]  ;;  %v122_v28 = vld [vmem:[#allocation2 + $0x140] sm:$0xff] }
  0x17   :  { %298 = vmatpush.msra.mxu3 %v142_v14  ;;  %279 = vmatpush.msra.mxu2 %v125_v16  ;;  %v91_v25 = vld [vmem:[#allocation2 + $0x48] sm:$0xff]  ;;  %v90_v29 = vld [vmem:[#allocation2 + $0x40] sm:$0xff]  ;;  %v121_v32 = vld [vmem:[#allocation2 + $0x138] sm:$0xff] }
  0x18   :  { %258 = vmatpush.msra.mxu1 %v110_v15  ;;  %239 = vmatpush.msra.mxu0 %v93_v17  ;;  %v139_v26 = vld [vmem:[#allocation2 + $0x1c8] sm:$0xff]  ;;  %v138_v30 = vld [vmem:[#allocation2 + $0x1c0] sm:$0xff]  ;;  %v89_v33 = vld [vmem:[#allocation2 + $0x38] sm:$0xff] }
  0x19   :  { %299 = vmatpush.msra.mxu3 %v141_v18  ;;  %280 = vmatpush.msra.mxu2 %v124_v20  ;;  %v107_v27 = vld [vmem:[#allocation2 + $0xc8] sm:$0xff]  ;;  %v106_v31 = vld [vmem:[#allocation2 + $0xc0] sm:$0xff]  ;;  %v137_v34 = vld [vmem:[#allocation2 + $0x1b8] sm:$0xff] }
  0x1a   :  { %259 = vmatpush.msra.mxu1 %v109_v19  ;;  %240 = vmatpush.msra.mxu0 %v92_v21  ;;  %v105_v35 = vld [vmem:[#allocation2 + $0xb8] sm:$0xff]  ;;  %v120_v36 = vld [vmem:[#allocation2 + $0x130] sm:$0xff]  ;;  %v119_v40 = vld [vmem:[#allocation2 + $0x128] sm:$0xff] }
  0x1b   :  { %300 = vmatpush.msra.mxu3 %v140_v22  ;;  %281 = vmatpush.msra.mxu2 %v123_v24  ;;  %v88_v37 = vld [vmem:[#allocation2 + $0x30] sm:$0xff]  ;;  %v87_v41 = vld [vmem:[#allocation2 + $0x28] sm:$0xff]  ;;  %v118_v44 = vld [vmem:[#allocation2 + $0x120] sm:$0xff] }
  0x1c   :  { %260 = vmatpush.msra.mxu1 %v108_v23  ;;  %241 = vmatpush.msra.mxu0 %v91_v25  ;;  %v136_v38 = vld [vmem:[#allocation2 + $0x1b0] sm:$0xff]  ;;  %v135_v42 = vld [vmem:[#allocation2 + $0x1a8] sm:$0xff]  ;;  %v86_v45 = vld [vmem:[#allocation2 + $0x20] sm:$0xff] }
  0x1d   :  { %301 = vmatpush.msra.mxu3 %v139_v26  ;;  %282 = vmatpush.msra.mxu2 %v122_v28  ;;  %v104_v39 = vld [vmem:[#allocation2 + $0xb0] sm:$0xff]  ;;  %v103_v43 = vld [vmem:[#allocation2 + $0xa8] sm:$0xff]  ;;  %v134_v46 = vld [vmem:[#allocation2 + $0x1a0] sm:$0xff] }
  0x1e   :  { %261 = vmatpush.msra.mxu1 %v107_v27  ;;  %242 = vmatpush.msra.mxu0 %v90_v29  ;;  %v102_v47 = vld [vmem:[#allocation2 + $0xa0] sm:$0xff]  ;;  %v117_v48 = vld [vmem:[#allocation2 + $0x118] sm:$0xff]  ;;  %v116_v52 = vld [vmem:[#allocation2 + $0x110] sm:$0xff] }
  0x1f   :  { %302 = vmatpush.msra.mxu3 %v138_v30  ;;  %283 = vmatpush.msra.mxu2 %v121_v32  ;;  %v85_v49 = vld [vmem:[#allocation2 + $0x18] sm:$0xff]  ;;  %v84_v53 = vld [vmem:[#allocation2 + $0x10] sm:$0xff]  ;;  %v115_v56 = vld [vmem:[#allocation2 + $0x108] sm:$0xff] }
  0x20   :  { %262 = vmatpush.msra.mxu1 %v106_v31  ;;  %243 = vmatpush.msra.mxu0 %v89_v33  ;;  %v133_v50 = vld [vmem:[#allocation2 + $0x198] sm:$0xff]  ;;  %v132_v54 = vld [vmem:[#allocation2 + $0x190] sm:$0xff]  ;;  %v83_v57 = vld [vmem:[#allocation2 + $0x8] sm:$0xff] }
  0x21   :  { %303 = vmatpush.msra.mxu3 %v137_v34  ;;  %284 = vmatpush.msra.mxu2 %v120_v36  ;;  %v101_v51 = vld [vmem:[#allocation2 + $0x98] sm:$0xff]  ;;  %v100_v55 = vld [vmem:[#allocation2 + $0x90] sm:$0xff]  ;;  %v131_v58 = vld [vmem:[#allocation2 + $0x188] sm:$0xff] }
  0x22   :  { %263 = vmatpush.msra.mxu1 %v105_v35  ;;  %244 = vmatpush.msra.mxu0 %v88_v37  ;;  %v99_v59 = vld [vmem:[#allocation2 + $0x88] sm:$0xff]  ;;  %v114_v60 = vld [vmem:[#allocation2 + $0x100] sm:$0xff]  ;;  %v193_v62 = vld [vmem:[#allocation2 + $0x378] sm:$0xff] }
  0x23   :  { %304 = vmatpush.msra.mxu3 %v136_v38  ;;  %285 = vmatpush.msra.mxu2 %v119_v40  ;;  %v82_v61 = vld [vmem:[#allocation2] sm:$0xff]  ;;  %v161_v0 = vld [vmem:[#allocation2 + $0x278] sm:$0xff]  ;;  %v192_v2 = vld [vmem:[#allocation2 + $0x370] sm:$0xff] }
  0x24   :  { %264 = vmatpush.msra.mxu1 %v104_v39  ;;  %245 = vmatpush.msra.mxu0 %v87_v41  ;;  %v130_v63 = vld [vmem:[#allocation2 + $0x180] sm:$0xff]  ;;  %v209_v1 = vld [vmem:[#allocation2 + $0x3f8] sm:$0xff]  ;;  %v160_v4 = vld [vmem:[#allocation2 + $0x270] sm:$0xff] }
  0x25   :  { %305 = vmatpush.msra.mxu3 %v135_v42  ;;  %286 = vmatpush.msra.mxu2 %v118_v44  ;;  %v98_v3 = vld [vmem:[#allocation2 + $0x80] sm:$0xff]  ;;  %v177_v5 = vld [vmem:[#allocation2 + $0x2f8] sm:$0xff]  ;;  %v191_v6 = vld [vmem:[#allocation2 + $0x368] sm:$0xff] }
  0x26   :  { %265 = vmatpush.msra.mxu1 %v103_v43  ;;  %246 = vmatpush.msra.mxu0 %v86_v45  ;;  %v208_v7 = vld [vmem:[#allocation2 + $0x3f0] sm:$0xff]  ;;  %v159_v8 = vld [vmem:[#allocation2 + $0x268] sm:$0xff]  ;;  %v190_v10 = vld [vmem:[#allocation2 + $0x360] sm:$0xff] }
  0x27   :  { %306 = vmatpush.msra.mxu3 %v134_v46  ;;  %287 = vmatpush.msra.mxu2 %v117_v48  ;;  %v176_v9 = vld [vmem:[#allocation2 + $0x2f0] sm:$0xff]  ;;  %v207_v11 = vld [vmem:[#allocation2 + $0x3e8] sm:$0xff]  ;;  %v158_v12 = vld [vmem:[#allocation2 + $0x260] sm:$0xff] }
  0x28   :  { %266 = vmatpush.msra.mxu1 %v102_v47  ;;  %247 = vmatpush.msra.mxu0 %v85_v49  ;;  %v175_v13 = vld [vmem:[#allocation2 + $0x2e8] sm:$0xff]  ;;  %v80_v14 = vld [vmem:[%s783_s0] sm:$0xff]  ;;  %v206_v16 = vld [vmem:[#allocation2 + $0x3e0] sm:$0xff] }
  0x29   :  { %307 = vmatpush.msra.mxu3 %v133_v50  ;;  %288 = vmatpush.msra.mxu2 %v116_v52  ;;  %v189_v15 = vld [vmem:[#allocation2 + $0x358] sm:$0xff]  ;;  %216 = vst [vmem:[#allocation1] ss:$4 sm:$0xff] %v80_v14  ;;  %v174_v18 = vld [vmem:[#allocation2 + $0x2e0] sm:$0xff]  ;;  %v188_v19 = vld [vmem:[#allocation2 + $0x350] sm:$0xff] }
  0x2a   :  { %267 = vmatpush.msra.mxu1 %v101_v51  ;;  %248 = vmatpush.msra.mxu0 %v84_v53  ;;  %v157_v17 = vld [vmem:[#allocation2 + $0x258] sm:$0xff]  ;;  %v156_v21 = vld [vmem:[#allocation2 + $0x250] sm:$0xff]  ;;  %v187_v23 = vld [vmem:[#allocation2 + $0x348] sm:$0xff] }
  0x2b   :  { %308 = vmatpush.msra.mxu3 %v132_v54  ;;  %289 = vmatpush.msra.mxu2 %v115_v56  ;;  %v205_v20 = vld [vmem:[#allocation2 + $0x3d8] sm:$0xff]  ;;  %v204_v24 = vld [vmem:[#allocation2 + $0x3d0] sm:$0xff]  ;;  %v81_v25 = vld [vmem:[%s783_s0 + $0x8] sm:$0xff] }
  0x2c   :  { %268 = vmatpush.msra.mxu1 %v100_v55  ;;  %249 = vmatpush.msra.mxu0 %v83_v57  ;;  %v173_v22 = vld [vmem:[#allocation2 + $0x2d8] sm:$0xff]  ;;  %v155_v26 = vld [vmem:[#allocation2 + $0x248] sm:$0xff]  ;;  %v172_v27 = vld [vmem:[#allocation2 + $0x2d0] sm:$0xff]  ;;  %218 = vst [vmem:[#allocation1 + $0x20] ss:$4 sm:$0xff] %v81_v25 }
  0x2d   :  { %309 = vmatpush.msra.mxu3 %v131_v58  ;;  %290 = vmatpush.msra.mxu2 %v114_v60  ;;  %v186_v28 = vld [vmem:[#allocation2 + $0x340] sm:$0xff]  ;;  %v203_v29 = vld [vmem:[#allocation2 + $0x3c8] sm:$0xff]  ;;  %v185_v32 = vld [vmem:[#allocation2 + $0x338] sm:$0xff] }
  0x2e   :  { %269 = vmatpush.msra.mxu1 %v99_v59  ;;  %250 = vmatpush.msra.mxu0 %v82_v61  ;;  %v154_v30 = vld [vmem:[#allocation2 + $0x240] sm:$0xff]  ;;  %v171_v31 = vld [vmem:[#allocation2 + $0x2c8] sm:$0xff]  ;;  %v153_v34 = vld [vmem:[#allocation2 + $0x238] sm:$0xff] }
  0x2f   :  { %355 = vmatpush.msrb.mxu2 %v193_v62  ;;  %310 = vmatpush.msra.mxu3 %v130_v63  ;;  %v202_v33 = vld [vmem:[#allocation2 + $0x3c0] sm:$0xff]  ;;  %v184_v36 = vld [vmem:[#allocation2 + $0x330] sm:$0xff]  ;;  %v201_v37 = vld [vmem:[#allocation2 + $0x3b8] sm:$0xff] }
  0x30   :  { %315 = vmatpush.msrb.mxu0 %v161_v0  ;;  %270 = vmatpush.msra.mxu1 %v98_v3  ;;  %v170_v35 = vld [vmem:[#allocation2 + $0x2c0] sm:$0xff]  ;;  %v152_v38 = vld [vmem:[#allocation2 + $0x230] sm:$0xff]  ;;  %v169_v39 = vld [vmem:[#allocation2 + $0x2b8] sm:$0xff] }
  0x31   :  { %375 = vmatpush.msrb.mxu3 %v209_v1  ;;  %356 = vmatpush.msrb.mxu2 %v192_v2  ;;  %v183_v40 = vld [vmem:[#allocation2 + $0x328] sm:$0xff]  ;;  %v200_v41 = vld [vmem:[#allocation2 + $0x3b0] sm:$0xff]  ;;  %v182_v44 = vld [vmem:[#allocation2 + $0x320] sm:$0xff] }
  0x32   :  { %316 = vmatpush.msrb.mxu0 %v160_v4  ;;  %335 = vmatpush.msrb.mxu1 %v177_v5  ;;  %v151_v42 = vld [vmem:[#allocation2 + $0x228] sm:$0xff]  ;;  %v168_v43 = vld [vmem:[#allocation2 + $0x2b0] sm:$0xff]  ;;  %v150_v47 = vld [vmem:[#allocation2 + $0x220] sm:$0xff] }
  0x33   :  { %357 = vmatpush.msrb.mxu2 %v191_v6  ;;  %376 = vmatpush.msrb.mxu3 %v208_v7  ;;  %v199_v45 = vld [vmem:[#allocation2 + $0x3a8] sm:$0xff]  ;;  %v181_v49 = vld [vmem:[#allocation2 + $0x318] sm:$0xff]  ;;  %v198_v50 = vld [vmem:[#allocation2 + $0x3a0] sm:$0xff] }
  0x34   :  { %317 = vmatpush.msrb.mxu0 %v159_v8  ;;  %336 = vmatpush.msrb.mxu1 %v176_v9  ;;  %v221_v46 = vld.sshfl [vmem:[#allocation1 + $0x10] sm:$0xff pattern:$0x73625140]  ;;  %v219_v51 = vld.sshfl [vmem:[#allocation1] sm:$0xff pattern:$0x73625140] }
  0x35   :  { %358 = vmatpush.msrb.mxu2 %v190_v10  ;;  %377 = vmatpush.msrb.mxu3 %v207_v11  ;;  %v167_v48 = vld [vmem:[#allocation2 + $0x2a8] sm:$0xff]  ;;  %v222_v52 = vld.sshfl [vmem:[#allocation1 + $0x18] sm:$0xff pattern:$0x73625140]  ;;  %v149_v53 = vld [vmem:[#allocation2 + $0x218] sm:$0xff] }
  0x36   :  { %318 = vmatpush.msrb.mxu0 %v158_v12  ;;  %337 = vmatpush.msrb.mxu1 %v175_v13  ;;  %v166_v54 = vld [vmem:[#allocation2 + $0x2a0] sm:$0xff]  ;;  %v180_v55 = vld [vmem:[#allocation2 + $0x310] sm:$0xff]  ;;  %v197_v56 = vld [vmem:[#allocation2 + $0x398] sm:$0xff] }
  0x37   :  { %359 = vmatpush.msrb.mxu2 %v189_v15  ;;  %378 = vmatpush.msrb.mxu3 %v206_v16  ;;  %v220_v57 = vld.sshfl [vmem:[#allocation1 + $0x8] sm:$0xff pattern:$0x73625140]  ;;  %v148_v58 = vld [vmem:[#allocation2 + $0x210] sm:$0xff]  ;;  %v165_v59 = vld [vmem:[#allocation2 + $0x298] sm:$0xff] }
  0x38   :  { %319 = vmatpush.msrb.mxu0 %v157_v17  ;;  %338 = vmatpush.msrb.mxu1 %v174_v18  ;;  %v179_v60 = vld [vmem:[#allocation2 + $0x308] sm:$0xff]  ;;  %v196_v61 = vld [vmem:[#allocation2 + $0x390] sm:$0xff]  ;;  %v178_v0 = vld [vmem:[#allocation2 + $0x300] sm:$0xff] }
  0x39   :  { %360 = vmatpush.msrb.mxu2 %v188_v19  ;;  %379 = vmatpush.msrb.mxu3 %v205_v20  ;;  %v147_v62 = vld [vmem:[#allocation2 + $0x208] sm:$0xff]  ;;  %v164_v63 = vld [vmem:[#allocation2 + $0x290] sm:$0xff]  ;;  %v146_v3 = vld [vmem:[#allocation2 + $0x200] sm:$0xff] }
  0x3a   :  { %320 = vmatpush.msrb.mxu0 %v156_v21  ;;  %339 = vmatpush.msrb.mxu1 %v173_v22  ;;  %v195_v1 = vld [vmem:[#allocation2 + $0x388] sm:$0xff]  ;;  %v194_v5 = vld [vmem:[#allocation2 + $0x380] sm:$0xff]  ;;  %v223_v6 = vld.sshfl [vmem:[#allocation1 + $0x20] sm:$0xff pattern:$0x73625140] }
  0x3b   :  { %361 = vmatpush.msrb.mxu2 %v187_v23  ;;  %380 = vmatpush.msrb.mxu3 %v204_v24  ;;  %v225_v2 = vld.sshfl [vmem:[#allocation1 + $0x30] sm:$0xff pattern:$0x73625140]  ;;  %v226_v7 = vld.sshfl [vmem:[#allocation1 + $0x38] sm:$0xff pattern:$0x73625140] }
  0x3c   :  { %321 = vmatpush.msrb.mxu0 %v155_v26  ;;  %340 = vmatpush.msrb.mxu1 %v172_v27  ;;  %v163_v4 = vld [vmem:[#allocation2 + $0x288] sm:$0xff]  ;;  %v162_v8 = vld [vmem:[#allocation2 + $0x280] sm:$0xff]  ;;  %v411_v9 = vld [vmem:[%s786_s3 + $0x78] sm:$0xff] }
  0x3d   :  { %362 = vmatpush.msrb.mxu2 %v186_v28  ;;  %381 = vmatpush.msrb.mxu3 %v203_v29  ;;  %v224_v10 = vld.sshfl [vmem:[#allocation1 + $0x28] sm:$0xff pattern:$0x73625140]  ;;  %v410_v11 = vld [vmem:[%s786_s3 + $0x70] sm:$0xff]  ;;  %v408_v13 = vld [vmem:[%s786_s3 + $0x60] sm:$0xff] }
  0x3e   :  { %322 = vmatpush.msrb.mxu0 %v154_v30  ;;  %341 = vmatpush.msrb.mxu1 %v171_v31  ;;  %v409_v12 = vld [vmem:[%s786_s3 + $0x68] sm:$0xff]  ;;  %v407_v14 = vld [vmem:[%s786_s3 + $0x58] sm:$0xff]  ;;  %v406_v15 = vld [vmem:[%s786_s3 + $0x50] sm:$0xff] }
  0x3f   :  { %363 = vmatpush.msrb.mxu2 %v185_v32  ;;  %382 = vmatpush.msrb.mxu3 %v202_v33  ;;  %v405_v16 = vld [vmem:[%s786_s3 + $0x48] sm:$0xff]  ;;  %v404_v17 = vld [vmem:[%s786_s3 + $0x40] sm:$0xff]  ;;  %v403_v18 = vld [vmem:[%s786_s3 + $0x38] sm:$0xff] }
  0x40   :  { %323 = vmatpush.msrb.mxu0 %v153_v34  ;;  %342 = vmatpush.msrb.mxu1 %v170_v35  ;;  %v402_v19 = vld [vmem:[%s786_s3 + $0x30] sm:$0xff]  ;;  %v401_v20 = vld [vmem:[%s786_s3 + $0x28] sm:$0xff]  ;;  %v400_v21 = vld [vmem:[%s786_s3 + $0x20] sm:$0xff] }
  0x41   :  { %364 = vmatpush.msrb.mxu2 %v184_v36  ;;  %383 = vmatpush.msrb.mxu3 %v201_v37  ;;  %v399_v22 = vld [vmem:[%s786_s3 + $0x18] sm:$0xff]  ;;  %v398_v23 = vld [vmem:[%s786_s3 + $0x10] sm:$0xff]  ;;  %v397_v24 = vld [vmem:[%s786_s3 + $0x8] sm:$0xff] }
  0x42   :  { %324 = vmatpush.msrb.mxu0 %v152_v38  ;;  %343 = vmatpush.msrb.mxu1 %v169_v39  ;;  %v396_v25 = vld [vmem:[%s786_s3] sm:$0xff]  ;;  %v451_v27 = vld [vmem:[#allocation5 + $0x70] sm:$0xff]  ;;  %v450_v28 = vld [vmem:[#allocation5 + $0x68] sm:$0xff] }
  0x43   :  { %365 = vmatpush.msrb.mxu2 %v183_v40  ;;  %384 = vmatpush.msrb.mxu3 %v200_v41  ;;  %v452_v26 = vld [vmem:[#allocation5 + $0x78] sm:$0xff]  ;;  %v449_v29 = vld [vmem:[#allocation5 + $0x60] sm:$0xff]  ;;  %v447_v32 = vld [vmem:[#allocation5 + $0x50] sm:$0xff] }
  0x44   :  { %325 = vmatpush.msrb.mxu0 %v151_v42  ;;  %344 = vmatpush.msrb.mxu1 %v168_v43  ;;  %v448_v30 = vld [vmem:[#allocation5 + $0x58] sm:$0xff]  ;;  %v446_v33 = vld [vmem:[#allocation5 + $0x48] sm:$0xff]  ;;  %v445_v36 = vld [vmem:[#allocation5 + $0x40] sm:$0xff] }
  0x45   :  { %366 = vmatpush.msrb.mxu2 %v182_v44  ;;  %385 = vmatpush.msrb.mxu3 %v199_v45  ;;  %v543_v31 = vld [vmem:[%s785_s2] ss:$0 sm:$0xff]  ;;  %v443_v41 = vld [vmem:[#allocation5 + $0x30] sm:$0xff]  ;;  %v442_v44 = vld [vmem:[#allocation5 + $0x28] sm:$0xff] }
  0x46   :  { %291 = vmatmul.f32.vlgmr.msra.gmra.mxu2 %v221_v46  ;;  %326 = vmatpush.msrb.mxu0 %v150_v47  ;;  %v444_v38 = vld [vmem:[#allocation5 + $0x38] sm:$0xff]  ;;  %v441_v46 = vld [vmem:[#allocation5 + $0x20] sm:$0xff] }
  0x47   :  { %345 = vmatpush.msrb.mxu1 %v167_v48  ;;  %367 = vmatpush.msrb.mxu2 %v181_v49  ;;  %v440_v49 = vld [vmem:[#allocation5 + $0x18] sm:$0xff] }
  0x48   :  { %386 = vmatpush.msrb.mxu3 %v198_v50  ;;  %251 = vmatmul.f32.vlgmr.msra.gmra.mxu0 %v219_v51 }
  0x49   :  { %311 = vmatmul.f32.vlgmr.msra.gmra.mxu3 %v222_v52  ;;  %327 = vmatpush.msrb.mxu0 %v149_v53 }
  0x4a   :  { %346 = vmatpush.msrb.mxu1 %v166_v54  ;;  %368 = vmatpush.msrb.mxu2 %v180_v55 }
  0x4b   :  { %387 = vmatpush.msrb.mxu3 %v197_v56  ;;  %271 = vmatmul.f32.vlgmr.msra.gmra.mxu1 %v220_v57  ;;  %v439_v57 = vld [vmem:[#allocation5 + $0x10] sm:$0xff] }
  0x4c   :  { %328 = vmatpush.msrb.mxu0 %v148_v58  ;;  %347 = vmatpush.msrb.mxu1 %v165_v59  ;;  %v438_v58 = vld [vmem:[#allocation5 + $0x8] sm:$0xff]  ;;  %v437_v59 = vld [vmem:[#allocation5] sm:$0xff] }
  0x4d   :  { %369 = vmatpush.msrb.mxu2 %v179_v60  ;;  %388 = vmatpush.msrb.mxu3 %v196_v61  ;;  %v493_v60 = vld [vmem:[#allocation7 + $0x78] sm:$0xff]  ;;  %v492_v61 = vld [vmem:[#allocation7 + $0x70] sm:$0xff] }
  0x4e   :  { %329 = vmatpush.msrb.mxu0 %v147_v62  ;;  %348 = vmatpush.msrb.mxu1 %v164_v63  ;;  %v491_v62 = vld [vmem:[#allocation7 + $0x68] sm:$0xff]  ;;  %v490_v63 = vld [vmem:[#allocation7 + $0x60] sm:$0xff] }
  0x4f   :  { %370 = vmatpush.msrb.mxu2 %v178_v0  ;;  %389 = vmatpush.msrb.mxu3 %v195_v1  ;;  %v489_v0 = vld [vmem:[#allocation7 + $0x58] sm:$0xff]  ;;  %v488_v1 = vld [vmem:[#allocation7 + $0x50] sm:$0xff] }
  0x50   :  { %371 = vmatmul.f32.vlgmr.msrb.gmra.mxu2 %v225_v2  ;;  %330 = vmatpush.msrb.mxu0 %v146_v3  ;;  %v487_v2 = vld [vmem:[#allocation7 + $0x48] sm:$0xff]  ;;  %v486_v3 = vld [vmem:[#allocation7 + $0x40] sm:$0xff] }
  0x51   :  { %349 = vmatpush.msrb.mxu1 %v163_v4  ;;  %390 = vmatpush.msrb.mxu3 %v194_v5  ;;  %v485_v4 = vld [vmem:[#allocation7 + $0x38] sm:$0xff]  ;;  %v484_v5 = vld [vmem:[#allocation7 + $0x30] sm:$0xff] }
  0x52   :  { %331 = vmatmul.f32.vlgmr.msrb.gmra.mxu0 %v223_v6  ;;  %391 = vmatmul.f32.vlgmr.msrb.gmra.mxu3 %v226_v7  ;;  %v483_v6 = vld [vmem:[#allocation7 + $0x28] sm:$0xff]  ;;  %v482_v7 = vld [vmem:[#allocation7 + $0x20] sm:$0xff] }
  0x53   :  { %350 = vmatpush.msrb.mxu1 %v162_v8  ;;  %416 = vmatpush.msra.mxu0 %v411_v9  ;;  %v481_v8 = vld [vmem:[#allocation7 + $0x18] sm:$0xff] }
  0x54   :  { %351 = vmatmul.f32.vlgmr.msrb.gmra.mxu1 %v224_v10  ;;  %498 = vmatpush.msra.mxu2 %v493_v60  ;;  %v544_v9 = vld [vmem:[%s787_s4] ss:$0 sm:$0xff] }
  0x55   :  { %417 = vmatpush.msra.mxu0 %v410_v11  ;;  %457 = vmatpush.msra.mxu1 %v452_v26 }
  0x56   :  { %499 = vmatpush.msra.mxu2 %v492_v61 }
  0x57   :  { %418 = vmatpush.msra.mxu0 %v409_v12  ;;  %458 = vmatpush.msra.mxu1 %v451_v27 }
  0x58   :  { %500 = vmatpush.msra.mxu2 %v491_v62 }
  0x59   :  { %419 = vmatpush.msra.mxu0 %v408_v13  ;;  %459 = vmatpush.msra.mxu1 %v450_v28  ;;  %v480_v13 = vld [vmem:[#allocation7 + $0x10] sm:$0xff] }
  0x5a   :  { %501 = vmatpush.msra.mxu2 %v490_v63 }
  0x5b   :  { %420 = vmatpush.msra.mxu0 %v407_v14  ;;  %460 = vmatpush.msra.mxu1 %v449_v29  ;;  %v479_v14 = vld [vmem:[#allocation7 + $0x8] sm:$0xff] }
  0x5c   :  { %502 = vmatpush.msra.mxu2 %v489_v0 }
  0x5d   :  { %421 = vmatpush.msra.mxu0 %v406_v15  ;;  %461 = vmatpush.msra.mxu1 %v448_v30  ;;  %v478_v15 = vld [vmem:[#allocation7] sm:$0xff] }
  0x5e   :  { %503 = vmatpush.msra.mxu2 %v488_v1 }
  0x5f   :  { %422 = vmatpush.msra.mxu0 %v405_v16  ;;  %462 = vmatpush.msra.mxu1 %v447_v32  ;;  %v545_v16 = vld [vmem:[%s789_s6] ss:$0 sm:$0xff] }
  0x60   :  { %504 = vmatpush.msra.mxu2 %v487_v2 }
  0x61   :  { %423 = vmatpush.msra.mxu0 %v404_v17  ;;  %463 = vmatpush.msra.mxu1 %v446_v33 }
  0x62   :  { %505 = vmatpush.msra.mxu2 %v486_v3 }
  0x63   :  { %424 = vmatpush.msra.mxu0 %v403_v18  ;;  %464 = vmatpush.msra.mxu1 %v445_v36 }
  0x64   :  { %506 = vmatpush.msra.mxu2 %v485_v4 }
  0x65   :  { %425 = vmatpush.msra.mxu0 %v402_v19  ;;  %465 = vmatpush.msra.mxu1 %v444_v38 }
  0x66   :  { %507 = vmatpush.msra.mxu2 %v484_v5 }
  0x67   :  { %426 = vmatpush.msra.mxu0 %v401_v20  ;;  %466 = vmatpush.msra.mxu1 %v443_v41  ;;  %v546_v20 = vld [vmem:[%s791_s8] ss:$0 sm:$0xff] }
  0x68   :  { %508 = vmatpush.msra.mxu2 %v483_v6 }
  0x69   :  { %427 = vmatpush.msra.mxu0 %v400_v21  ;;  %467 = vmatpush.msra.mxu1 %v442_v44 }
  0x6a   :  { %509 = vmatpush.msra.mxu2 %v482_v7 }
  0x6b   :  { %428 = vmatpush.msra.mxu0 %v399_v22  ;;  %468 = vmatpush.msra.mxu1 %v441_v46 }
  0x6c   :  { %510 = vmatpush.msra.mxu2 %v481_v8 }
  0x6d   :  { %429 = vmatpush.msra.mxu0 %v398_v23  ;;  %469 = vmatpush.msra.mxu1 %v440_v49 }
  0x6e   :  { %511 = vmatpush.msra.mxu2 %v480_v13 }
  0x6f   :  { %430 = vmatpush.msra.mxu0 %v397_v24  ;;  %470 = vmatpush.msra.mxu1 %v439_v57 }
  0x70   :  { %512 = vmatpush.msra.mxu2 %v479_v14 }
  0x71   :  { %431 = vmatpush.msra.mxu0 %v396_v25  ;;  %471 = vmatpush.msra.mxu1 %v438_v58 }
  0x72   :  { %513 = vmatpush.msra.mxu2 %v478_v15 }
  0x73   :  { %472 = vmatpush.msra.mxu1 %v437_v59 }
  0xc5   :  { %v252_v34 = vpop.f32.mrf.mxu0 }
  0xc6   :  { %v253_v35 = vadd.f32 %v543_v31, %v252_v34 }
  0xc8   :  { %v272_v37 = vpop.f32.mrf.mxu1 }
  0xc9   :  { %v273_v39 = vadd.f32 %v272_v37, %v253_v35  ;;  %v292_v40 = vpop.f32.mrf.mxu2 }
  0xcb   :  { %v293_v42 = vadd.f32 %v292_v40, %v273_v39 }
  0xcc   :  { %v312_v43 = vpop.f32.mrf.mxu3 }
  0xcd   :  { %v313_v45 = vadd.f32 %v312_v43, %v293_v42 }
  0xcf   :  { %v332_v47 = vpop.f32.mrf.mxu0 }
  0xd0   :  { %v333_v48 = vadd.f32 %v332_v47, %v313_v45 }
  0xd1   :  { %v352_v50 = vpop.f32.mrf.mxu1 }
  0xd2   :  { %v353_v51 = vadd.f32 %v352_v50, %v333_v48 }
  0xd3   :  { %v372_v52 = vpop.f32.mrf.mxu2 }
  0xd4   :  { %v373_v53 = vadd.f32 %v372_v52, %v353_v51 }
  0xd5   :  { %v392_v54 = vpop.f32.mrf.mxu3 }
  0xd6   :  { %v393_v55 = vadd.f32 %v392_v54, %v373_v53 }
  0xd8   :  { %v395_v56 = vmax.f32 %v393_v55, 0.0 }
  0xda   :  { %432 = vmatmul.f32.vlgmr.msra.gmra.mxu0 %v395_v56 }
 0x157   :  { %v433_v10 = vpop.f32.mrf.mxu0 }
 0x158   :  { %v434_v11 = vadd.f32 %v544_v9, %v433_v10 }
 0x15a   :  { %v436_v12 = vmax.f32 %v434_v11, 0.0 }
 0x15c   :  { %473 = vmatmul.f32.vlgmr.msra.gmra.mxu1 %v436_v12 }
 0x1d9   :  { %v474_v17 = vpop.f32.mrf.mxu1 }
 0x1da   :  { %v475_v18 = vadd.f32 %v545_v16, %v474_v17 }
 0x1dc   :  { %v477_v19 = vmax.f32 %v475_v18, 0.0 }
 0x1de   :  { %514 = vmatmul.f32.vlgmr.msra.gmra.mxu2 %v477_v19 }
 0x261   :  { %v515_v21 = vpop.f32.mrf.mxu2 }
 0x262   :  { %v516_v22 = vadd.f32 %v546_v20, %v515_v21 }
 0x264   :  { %518 = vst [vmem:[#allocation8] sm:$0x3] %v516_v22 }
 0x265   :  { %529 = dma.vmem_to_hbm [thread:$0]  %s525_s18, 32, %s527_s21, [#allocation4]  }
 0x266   :  { %647 = dma.done.wait [#allocation4], 32  }
 0x267   :  { %648 = vsyncadd [#allocation4], 4294967264 }
 0x268   :  { %534 = vsyncpa [#allocation3], 1 }
 0x269   :  { %535 = vsyncpa [#allocation6], 1 }
 0x26a   :  { %536 = vsyncpa [#allocation4], 1 }

</bundles_post_ra>
